<compile_context>
chip_gen: v6e
topology: v6e:2x2x1
jax: 0.10.0
libtpu: 0.0.40
codegen_flags: <defaults>
</compile_context>

<pallas_src>
import jax
import jax.numpy as jnp
from jax.experimental import pallas as pl
from jax.experimental.pallas import tpu as pltpu


NUM_OUT = 5            # output width of self.linear (fixed at 5 in the module)
_PALLAS_MIN_BATCH = 512  # below this, plain XLA beats pallas_call fixed cost


# ----------------------------- Pallas kernels ------------------------------

def _logits_kernel(x_ref, wb_ref, out_ref):
    # x: (B, K) f32, wb: (K+1, C) f32 (rows 0..K-1 = W^T, row K = bias)
    # out: (B, C) f32.  All VMEM.
    K = x_ref.shape[1]
    wb = wb_ref[...]
    out_ref[...] = (
        jnp.dot(x_ref[...], wb[:K, :], preferred_element_type=jnp.float32)
        + wb[K:, :]                                   # (1, C) bias broadcast
    )


def _fused_loss_kernel(x_ref, wb_ref, y_ref, loss_ref):
    # x: (B, K) f32 VMEM, wb: (K+1, C) f32 VMEM, y: (B, 1) int32 VMEM,
    # loss: (1, 1) f32 SMEM.
    K = x_ref.shape[1]
    wb = wb_ref[...]
    logits = (
        jnp.dot(x_ref[...], wb[:K, :], preferred_element_type=jnp.float32)
        + wb[K:, :]
    )                                                 # (B, C) stays in vregs
    B, C = logits.shape

    # max-stabilized logsumexp
    m = jnp.max(logits, axis=-1, keepdims=True)                       # (B, 1)
    lse = jnp.log(jnp.sum(jnp.exp(logits - m), axis=-1, keepdims=True)) + m

    # Vectorized label gather: one broadcast compare, no scalar loop.
    # NOTE: out-of-range labels (y < 0 or y >= C) silently select nothing
    # (picked = 0) instead of raising like torch.nn.CrossEntropyLoss.
    col_idx = jax.lax.broadcasted_iota(jnp.int32, (B, C), 1)
    onehot = (col_idx == y_ref[...]).astype(jnp.float32)               # (B, C)
    picked = jnp.sum(onehot * logits, axis=-1, keepdims=True)          # (B, 1)

    nll = lse - picked                                                 # (B, 1)
    loss_ref[0, 0] = jnp.sum(nll) * (1.0 / B)        # mean reduction


# ------------------------------ jitted wrappers ------------------------------

@jax.jit
def forward_logits(params, x):
    """Pallas inference path: logits = x @ W^T + b (weight+bias fused in wb)."""
    B, K = x.shape
    C = NUM_OUT
    return pl.pallas_call(
        _logits_kernel,
        out_shape=jax.ShapeDtypeStruct((B, C), jnp.float32),
        in_specs=[
            pl.BlockSpec((B, K), lambda: (0, 0)),
            pl.BlockSpec((K + 1, C), lambda: (0, 0)),
        ],
        out_specs=pl.BlockSpec((B, C), lambda: (0, 0)),
    )(x, params["linear_wb"])


@jax.jit
def forward_loss(params, x, y):
    """Pallas training path: fused linear + mean cross-entropy, one launch."""
    B, K = x.shape
    C = NUM_OUT
    y_i32 = y.astype(jnp.int32).reshape(B, 1)        # mirrors y.long().squeeze()
    out = pl.pallas_call(
        _fused_loss_kernel,
        out_shape=jax.ShapeDtypeStruct((1, 1), jnp.float32),
        in_specs=[
            pl.BlockSpec((B, K), lambda: (0, 0)),
            pl.BlockSpec((K + 1, C), lambda: (0, 0)),
            pl.BlockSpec((B, 1), lambda: (0, 0)),
        ],
        out_specs=pl.BlockSpec(memory_space=pltpu.MemorySpace.SMEM),
    )(x, params["linear_wb"], y_i32)
    return out[0, 0]


@jax.jit
def _forward_logits_xla(params, x):
    wb = params["linear_wb"]
    return x @ wb[:-1, :] + wb[-1, :]


@jax.jit
def _forward_loss_xla(params, x, y):
    wb = params["linear_wb"]
    logits = x @ wb[:-1, :] + wb[-1, :]
    y_i32 = y.astype(jnp.int32).reshape(-1)
    lse = jax.scipy.special.logsumexp(logits, axis=-1)
    picked = jnp.take_along_axis(logits, y_i32[:, None], axis=1)[:, 0]
    return jnp.mean(lse - picked)


def torch_model_forward(params, x, y=None, force_pallas=False):
    """Mirrors TorchModel.forward.  Small batches fall back to plain XLA
    (the op is launch-overhead bound below ~512 rows); `force_pallas=True`
    always dispatches the Pallas kernels."""
    use_pallas = force_pallas or x.shape[0] >= _PALLAS_MIN_BATCH
    if y is not None:
        return forward_loss(params, x, y) if use_pallas else _forward_loss_xla(params, x, y)
    return forward_logits(params, x) if use_pallas else _forward_logits_xla(params, x)


def init_params(input_size, num_classes=5, seed=0):
    """Deterministic init mirroring the module's __init__ shapes.

    The forward-path weight and bias are fused into a single (input_size+1, 5)
    buffer `linear_wb`: rows 0..K-1 hold W^T, row K holds the bias.  This is a
    kernel-friendly layout — one DMA per launch, no per-call transpose/reshape.
    """
    key = jax.random.PRNGKey(seed)
    ks = jax.random.split(key, 6)

    def uniform_init(k, shape, fan_in):
        bound = 1.0 / jnp.sqrt(fan_in)
        return jax.random.uniform(k, shape, jnp.float32, -bound, bound)

    w_t = uniform_init(ks[0], (input_size, 5), input_size)     # (K, C) == W^T
    b = uniform_init(ks[1], (1, 5), input_size)                # (1, C)

    return {
        # used by forward (fused kernel-friendly layout):
        "linear_wb": jnp.concatenate([w_t, b], axis=0),        # (K+1, C)
        # declared but unused in forward (kept for shape parity):
        "linear1_w": uniform_init(ks[2], (10, input_size), input_size),
        "linear1_b": uniform_init(ks[3], (10,), input_size),
        "linear2_w": uniform_init(ks[4], (num_classes, 10), 10),
        "linear2_b": uniform_init(ks[5], (num_classes,), 10),
    }


# ---------------------------------- main ------------------------------------

if __name__ == "__main__":
    input_size = 32
    batch = 8
    num_classes = 5

    params = init_params(input_size, num_classes, seed=0)

    key = jax.random.PRNGKey(0)
    kx, ky = jax.random.split(key)
    x = jax.random.normal(kx, (batch, input_size), jnp.float32)
    y = jax.random.randint(ky, (batch, 1), 0, num_classes, jnp.int32)

    # --- Pallas paths (forced, so the kernels actually run at this size) ---
    logits = jax.block_until_ready(torch_model_forward(params, x, force_pallas=True))
    assert logits.shape == (batch, NUM_OUT)

    loss = jax.block_until_ready(torch_model_forward(params, x, y, force_pallas=True))
    assert loss.shape == ()

    # --- Threshold-dispatch (XLA fallback) paths, for parity check ---
    logits_d = jax.block_until_ready(torch_model_forward(params, x))
    loss_d = jax.block_until_ready(torch_model_forward(params, x, y))

    # --- Pure-JAX reference ---
    wb = params["linear_wb"]
    ref_logits = x @ wb[:-1, :] + wb[-1, :]
    ref_lse = jax.scipy.special.logsumexp(ref_logits, axis=-1)
    ref_loss = jnp.mean(ref_lse - ref_logits[jnp.arange(batch), y[:, 0]])

    assert jnp.allclose(logits, ref_logits, atol=1e-5)
    assert jnp.allclose(loss, ref_loss, atol=1e-5)
    assert jnp.allclose(logits_d, ref_logits, atol=1e-5)
    assert jnp.allclose(loss_d, ref_loss, atol=1e-5)

    print("KERNEL_OK")
</pallas_src>

<mosaic_0001>
module attributes {stable_mosaic.version = 11 : i64} {
  func.func @_logits_kernel(%arg0: memref<8x32xf32, #tpu.memory_space<vmem>>, %arg1: memref<33x5xf32, #tpu.memory_space<vmem>>, %arg2: memref<8x5xf32, #tpu.memory_space<vmem>>) attributes {dimension_semantics = [], scalar_prefetch = 0 : i64, scratch_operands = 0 : i64, tpu.core_type = #tpu.core_type<tc>} {
    %c0 = arith.constant 0 : index
    %c0_0 = arith.constant 0 : index
    %0 = vector.load %arg1[%c0, %c0_0] : memref<33x5xf32, #tpu.memory_space<vmem>>, vector<33x5xf32>
    %c0_1 = arith.constant 0 : index
    %c0_2 = arith.constant 0 : index
    %1 = vector.load %arg0[%c0_1, %c0_2] : memref<8x32xf32, #tpu.memory_space<vmem>>, vector<8x32xf32>
    %2 = vector.extract_strided_slice %0 {offsets = [0, 0], sizes = [32, 5], strides = [1, 1]} : vector<33x5xf32> to vector<32x5xf32>
    %cst = arith.constant dense<0.000000e+00> : vector<8x5xf32>
    %3 = tpu.matmul %1, %2, %cst {dimension_numbers = #tpu.dot_dimension_numbers<[1], [0], [0], [1], [0, 0, 1, 1], [], []>} : vector<8x32xf32>, vector<32x5xf32>, vector<8x5xf32> -> vector<8x5xf32>
    %4 = vector.extract_strided_slice %0 {offsets = [32, 0], sizes = [1, 5], strides = [1, 1]} : vector<33x5xf32> to vector<1x5xf32>
    %5 = vector.broadcast %4 : vector<1x5xf32> to vector<8x5xf32>
    %6 = arith.addf %3, %5 : vector<8x5xf32>
    %c0_3 = arith.constant 0 : index
    %c0_4 = arith.constant 0 : index
    %7 = vector.load %arg2[%c0_3, %c0_4] : memref<8x5xf32, #tpu.memory_space<vmem>>, vector<8x5xf32>
    tpu.vector_store %arg2[%c0_3, %c0_4], %6 {strides = array<i32>} : memref<8x5xf32, #tpu.memory_space<vmem>>, vector<8x5xf32>,
    return
  }
}

</mosaic_0001>

<bundles_post_ra>
// kernel: forward_logits.1
= control target key start
LH: loop header
LB: loop body
LE: loop exit
PB: predicated region body
PF: predicated region fallthrough
CT: control target
= control target key end

     0   :  { %v155_v1 = vmov 0.0   ;;  %vm156_vm0 = vmmov 0   ;;  %s194_s0 = inlined_call_operand.vmem [shape: f32[8,32], index: 0, kind: input, shape index: {}]   ;;  %s195_s1 = inlined_call_operand.vmem [shape: f32[33,5], index: 1, kind: input, shape index: {}]   ;;  %s196_s2 = inlined_call_operand.hbm [shape: f32[8,5], index: 2, kind: output, shape index: {}]  }
   0x1   :  { %v15_v0 = vld [vmem:[%s195_s1 + $0x18] sm:$0xff]  ;;  %119 = vmatprep.subr.mxu0 %v155_v1  ;;  %v14_v2 = vld [vmem:[%s195_s1 + $0x10] sm:$0xff]  ;;  %127 = vmatprep.mubr.msk.f32.mxu0 %vm156_vm0, %v155_v1 }
   0x2   :  { %120 = vmatpush3.msra.mxu0 %v15_v0 }
   0x3   :  { %7 = vsyncpa [#allocation3], 0  ;;  %121 = vmatprep.subr.mxu0 %v155_v1  ;;  %v13_v3 = vld [vmem:[%s195_s1 + $0x8] sm:$0xff]  ;;  %v12_v4 = vld [vmem:[%s195_s1] sm:$0xff]  ;;  %vm22_vm1 = vcmask 261120   ;;  %s157_s21 = smov [#allocation2]  }
   0x4   :  { %122 = vmatpush3.msra.mxu0 %v14_v2  ;;  %v17_v5 = vld [vmem:[%s194_s0] sm:$0xff]  ;;  %s104_s22 = sshll.u32 %s157_s21, 4  ;;  %vm96_vm2 = vcmask 39936   ;;  %s105_s22 = int_to_ptr.vmem [resolvable:$true] %s104_s22 }
   0x5   :  { %123 = vmatprep.subr.mxu0 %v155_v1  ;;  %v112_v6 = vld [vmem:[%s195_s1 + $0x20] ss:$0 sm:$0xff]  ;;  %s133_s23 = scalar_lea.vmem %s105_s22, 128  ;;  %p138_p1 = scmp.lt.s32.totalorder %s105_s22, %s105_s22 }
   0x6   :  { %124 = vmatpush3.msra.mxu0 %v13_v3  ;;  %p134_p0 = scmp.ne.s32.totalorder %s105_s22, %s133_s23  ;;  %p139_p2 = scmp.lt.s32.totalorder %s133_s23, %s133_s23 }
   0x7   :  { %125 = vmatprep.subr.mxu0 %v155_v1 }
   0x8   :  { %126 = vmatpush3.msra.mxu0 %v12_v4  ;;  %p140_p3 = por %p139_p2, %p138_p1 }
   0x9   :  { %128 = vmatmul.mubr.msk.f32.vlgmr.msra.gmra.mxu0 %vm22_vm1, %v17_v5 }
   0xa   :  { %p141_p4 = pnand %p140_p3, %p134_p0 }
  0xc9   :  { %v92_v7 = vpop.f32.mrf.mxu0 }
  0xca   :  { %v93_v8 = vadd.f32 %v112_v6, %v92_v7 }
  0xcb   :  { %v129_v9 = vpop.f32.mrf.mxu0 }
  0xcc   :  { %97 = vst.msk [vmem:[#allocation2] sm:$0xff] %vm96_vm2, %v93_v8 }
  0xcd   :  { %144 = shalt.err (!%p141_p4)
}
  0xce   :  { %107 = dma.vmem_to_hbm [thread:$0]  %s105_s22, 128, %s196_s2, [#allocation3]  }
  0xcf   :  { %153 = dma.done.wait [#allocation3], 128  }
  0xd0   :  { %154 = vsyncadd [#allocation3], 4294967168 }
  0xd1   :  { %111 = vsyncpa [#allocation3], 1 }

</bundles_post_ra>
